<compile_context>
chip_gen: v7x
topology: tpu7x:2x2x1
jax: 0.10.0
libtpu: 0.0.40
codegen_flags: <defaults>
</compile_context>

<pallas_src>
import math
import jax
import jax.numpy as jnp
from jax.experimental import pallas as pl
from jax.experimental.pallas import tpu as pltpu


def _round_up(a, m):
    return (a + m - 1) // m * m


def _tpu_generation():
    try:
        kind = jax.devices()[0].device_kind.lower()
    except Exception:
        return "unknown"
    if "v7" in kind or "tpu7" in kind:
        return "v7x"
    if "v6" in kind:
        return "v6e"
    if "v5 lite" in kind or "v5e" in kind or "v5lite" in kind:
        return "v5e"
    return "unknown"


def _vmem_budget_bytes(gen):
    cap = None
    try:
        cap = int(pltpu.get_tpu_info().vmem_capacity_bytes)
    except Exception:
        cap = None
    if cap is None:
        cap = 64 * 2**20 if gen == "v7x" else 128 * 2**20
    # Never request the full physical VMEM: leave headroom for Mosaic internals.
    # v7x (64 MiB) -> ~54 MiB;  v5e/v6e (128 MiB) -> ~108 MiB.
    return int(min(cap - 8 * 2**20, 0.85 * cap))


def _default_tiles(gen):
    # (TM, TK) targets per TPU generation (see header notes).
    if gen == "v7x":
        return 512, 256
    if gen == "v6e":
        return 1024, 512
    if gen == "v5e":
        return 512, 512
    return 512, 512


def _ffn_kernel_acc_out(x_ref, w1_ref, b1_ref, w2_ref, b2_ref, o_ref):
    """f32-output variant: accumulate fc2 partials directly into o_ref (no scratch)."""
    k = pl.program_id(1)
    # fc1 chunk: (TM, H_pad) @ (H_pad, TK) -> f32, + b1 chunk, ReLU.
    h = jnp.dot(x_ref[...], w1_ref[...], preferred_element_type=jnp.float32)
    h = jnp.maximum(h + b1_ref[...], 0.0)
    # dropout (eval mode) -> identity
    # fc2 partial: (TM, TK) @ (TK, H_pad) in f32.
    contrib = jnp.dot(h.astype(w2_ref.dtype), w2_ref[...],
                      preferred_element_type=jnp.float32)

    @pl.when(k == 0)
    def _init():
        o_ref[...] = contrib + b2_ref[...]

    @pl.when(k > 0)
    def _accum():
        o_ref[...] += contrib


def _ffn_kernel_acc_scratch(x_ref, w1_ref, b1_ref, w2_ref, b2_ref, o_ref, acc_ref):
    """Generic-output variant: f32 VMEM accumulator, cast exactly once at the end."""
    k = pl.program_id(1)

    @pl.when(k == 0)
    def _init():
        acc_ref[...] = jnp.zeros_like(acc_ref)

    h = jnp.dot(x_ref[...], w1_ref[...], preferred_element_type=jnp.float32)
    h = jnp.maximum(h + b1_ref[...], 0.0)
    # dropout (eval mode) -> identity
    acc_ref[...] += jnp.dot(h.astype(w2_ref.dtype), w2_ref[...],
                            preferred_element_type=jnp.float32)

    @pl.when(k == pl.num_programs(1) - 1)
    def _finalize():
        o_ref[...] = (acc_ref[...] + b2_ref[...]).astype(o_ref.dtype)


def prepare_ffn_params(w1, b1, w2, b2, *, compute_dtype=jnp.bfloat16, tk=None):
    """Pad + cast FFN weights once, outside the per-call hot path.

    w1: (H, 4H), b1: (4H,), w2: (4H, H), b2: (H,).
    Default compute dtype is bf16 (MXU-friendly on all generations, mandatory-ish
    on v5e); biases stay f32 (they feed the f32 accumulation path).
    """
    gen = _tpu_generation()
    if tk is None:
        _, tk = _default_tiles(gen)
    H, H4 = w1.shape
    H_pad = _round_up(H, 128)                 # lane-dense output width
    TK = min(tk, _round_up(H4, 128))
    H4_pad = _round_up(H4, TK)

    compute_dtype = jnp.dtype(compute_dtype)
    w1_p = jnp.zeros((H_pad, H4_pad), compute_dtype).at[:H, :H4].set(
        w1.astype(compute_dtype))
    b1_p = jnp.zeros((1, H4_pad), jnp.float32).at[0, :H4].set(
        b1.astype(jnp.float32))
    w2_p = jnp.zeros((H4_pad, H_pad), compute_dtype).at[:H4, :H].set(
        w2.astype(compute_dtype))
    b2_p = jnp.zeros((1, H_pad), jnp.float32).at[0, :H].set(
        b2.astype(jnp.float32))
    return dict(w1=w1_p, b1=b1_p, w2=w2_p, b2=b2_p,
                H=H, H4=H4, H_pad=H_pad, H4_pad=H4_pad, TK=TK,
                compute_dtype=compute_dtype, gen=gen)


def feed_forward(x, params, *, tm=None):
    """x: (batch, seq, hidden). params: output of prepare_ffn_params()."""
    B, S, H = x.shape
    assert H == params["H"], (H, params["H"])
    gen = params["gen"]
    compute_dtype = params["compute_dtype"]
    H_pad, H4_pad, TK = params["H_pad"], params["H4_pad"], params["TK"]
    out_dtype = x.dtype
    use_acc_in_out = out_dtype == jnp.float32

    M = B * S
    M_8 = _round_up(M, 8)
    tm_default, _ = _default_tiles(gen)
    TM = _round_up(min(tm if tm is not None else tm_default, M_8), 8)

    # --- VMEM budgeting (large-H guard: shrink TM until the tiles fit) ---
    budget = _vmem_budget_bytes(gen)
    c_item = compute_dtype.itemsize
    o_item = jnp.dtype(out_dtype).itemsize

    def vmem_est(tm_):
        e = 2 * tm_ * H_pad * c_item                     # x tiles (double-buffered)
        e += 2 * (H_pad * TK + TK * H_pad) * c_item      # w1 / w2 chunks
        e += 2 * (8 * TK + 8 * H_pad) * 4                # biases (sublane-padded)
        e += 2 * tm_ * H_pad * o_item                    # output tiles
        if not use_acc_in_out:
            e += tm_ * H_pad * 4                         # f32 accumulator scratch
        return e

    while vmem_est(TM) > budget and TM > 8:
        TM = max(8, _round_up(TM // 2, 8))

    # v7x has 2 TensorCores: make sure the "parallel" M axis has >= 2 tiles.
    if gen == "v7x" and M_8 // TM < 2 and M_8 >= 16:
        TM = _round_up((M_8 + 1) // 2, 8)

    M_pad = _round_up(M_8, TM)
    grid = (M_pad // TM, H4_pad // TK)

    # Per-call work on x only: cast + ragged M / lane edge (weights prepared once).
    x2 = x.reshape(M, H).astype(compute_dtype)
    if M_pad == M and H_pad == H:
        x_p = x2
    else:
        x_p = jnp.zeros((M_pad, H_pad), compute_dtype).at[:M, :H].set(x2)

    vmem_limit = int(min(budget, max(int(1.5 * vmem_est(TM)), 16 * 2**20)))

    # Honest byte count: w1/w2/b1 are re-streamed once per M-tile; x and out once.
    cost = pl.CostEstimate(
        flops=4 * M_pad * H_pad * H4_pad,
        bytes_accessed=int(
            M_pad * H_pad * c_item
            + grid[0] * (2 * H_pad * H4_pad * c_item + H4_pad * 4)
            + H_pad * 4
            + M_pad * H_pad * o_item),
        transcendentals=0,
    )

    in_specs = [
        pl.BlockSpec((TM, H_pad), lambda i, k: (i, 0)),    # x tile (resident over k)
        pl.BlockSpec((H_pad, TK), lambda i, k: (0, k)),    # w1 chunk
        pl.BlockSpec((1, TK), lambda i, k: (0, k)),        # b1 chunk
        pl.BlockSpec((TK, H_pad), lambda i, k: (k, 0)),    # w2 chunk
        pl.BlockSpec((1, H_pad), lambda i, k: (0, 0)),     # b2
    ]
    out_spec = pl.BlockSpec((TM, H_pad), lambda i, k: (i, 0))

    if use_acc_in_out:
        kernel, scratch = _ffn_kernel_acc_out, []
    else:
        kernel = _ffn_kernel_acc_scratch
        scratch = [pltpu.VMEM((TM, H_pad), jnp.float32)]

    out_p = pl.pallas_call(
        kernel,
        out_shape=jax.ShapeDtypeStruct((M_pad, H_pad), out_dtype),
        grid_spec=pltpu.PrefetchScalarGridSpec(
            num_scalar_prefetch=0,
            grid=grid,
            in_specs=in_specs,
            out_specs=out_spec,
            scratch_shapes=scratch,
        ),
        compiler_params=pltpu.CompilerParams(
            dimension_semantics=("parallel", "arbitrary"),
            vmem_limit_bytes=vmem_limit,
        ),
        cost_estimate=cost,
    )(x_p, params["w1"], params["b1"], params["w2"], params["b2"])

    # Padded rows are NOT zero (relu(b1) @ w2 + b2): this slice is load-bearing.
    return out_p[:M, :H].reshape(B, S, H)


def init_linear_params(key, in_features, out_features):
    """Deterministic PyTorch-style nn.Linear init: U(-1/sqrt(in), 1/sqrt(in))."""
    kw, kb = jax.random.split(key)
    bound = 1.0 / math.sqrt(in_features)
    # PyTorch stores weight as (out, in); we keep (in, out) for x @ W.
    w = jax.random.uniform(kw, (in_features, out_features), jnp.float32,
                           minval=-bound, maxval=bound)
    b = jax.random.uniform(kb, (out_features,), jnp.float32,
                           minval=-bound, maxval=bound)
    return w, b


if __name__ == "__main__":
    hidden_dim = 32
    batch, seq = 2, 8

    key = jax.random.PRNGKey(0)
    kx, k1, k2 = jax.random.split(key, 3)

    x = jax.random.normal(kx, (batch, seq, hidden_dim), jnp.float32)
    w1, b1 = init_linear_params(k1, hidden_dim, hidden_dim * 4)
    w2, b2 = init_linear_params(k2, hidden_dim * 4, hidden_dim)

    # Reference in plain JAX (dropout is identity in eval mode).
    ref = jnp.maximum(x.reshape(-1, hidden_dim) @ w1 + b1, 0.0) @ w2 + b2
    ref = ref.reshape(batch, seq, hidden_dim)

    # f32 operand path (tight check; f32 output -> accumulate-into-output kernel).
    params_f32 = prepare_ffn_params(w1, b1, w2, b2, compute_dtype=jnp.float32)
    out_f32 = jax.block_until_ready(feed_forward(x, params_f32))
    assert out_f32.shape == (batch, seq, hidden_dim)
    assert jnp.allclose(out_f32, ref, atol=1e-4, rtol=1e-4)

    # Default bf16 operand / f32 accumulation path (MXU-peak path, f32 output).
    params_bf16 = prepare_ffn_params(w1, b1, w2, b2)
    out_bf16 = jax.block_until_ready(feed_forward(x, params_bf16))
    assert out_bf16.shape == (batch, seq, hidden_dim)
    assert jnp.allclose(out_bf16, ref, atol=5e-2, rtol=5e-2)

    # bf16 activations / bf16 output -> exercises the f32-scratch kernel variant.
    out_bf16_io = jax.block_until_ready(
        feed_forward(x.astype(jnp.bfloat16), params_bf16))
    assert out_bf16_io.dtype == jnp.bfloat16
    assert jnp.allclose(out_bf16_io.astype(jnp.float32), ref, atol=1e-1, rtol=1e-1)

    print("KERNEL_OK")
</pallas_src>

<mosaic_0001>
module attributes {stable_mosaic.version = 11 : i64} {
  func.func @_ffn_kernel_acc_out(%arg0: i32, %arg1: i32, %arg2: memref<16x128xf32, #tpu.memory_space<vmem>>, %arg3: memref<128x128xf32, #tpu.memory_space<vmem>>, %arg4: memref<1x128xf32, #tpu.memory_space<vmem>>, %arg5: memref<128x128xf32, #tpu.memory_space<vmem>>, %arg6: memref<1x128xf32, #tpu.memory_space<vmem>>, %arg7: memref<16x128xf32, #tpu.memory_space<vmem>>) attributes {dimension_semantics = [#tpu.dimension_semantics<parallel>, #tpu.dimension_semantics<arbitrary>], iteration_bounds = array<i64: 1, 1>, scalar_prefetch = 0 : i64, scratch_operands = 0 : i64, tpu.core_type = #tpu.core_type<tc>, window_params = [{transform_indices = @transform_0, window_bounds = array<i64: 16, 128>}, {transform_indices = @transform_1, window_bounds = array<i64: 128, 128>}, {transform_indices = @transform_2, window_bounds = array<i64: 1, 128>}, {transform_indices = @transform_3, window_bounds = array<i64: 128, 128>}, {pipeline_mode = #tpu.pipeline_mode<synchronous>, transform_indices = @transform_4, window_bounds = array<i64: 1, 128>}, {transform_indices = @transform_5, window_bounds = array<i64: 16, 128>}]} {
    %c0 = arith.constant 0 : index
    %c0_0 = arith.constant 0 : index
    %0 = vector.load %arg2[%c0, %c0_0] : memref<16x128xf32, #tpu.memory_space<vmem>>, vector<16x128xf32>
    %c0_1 = arith.constant 0 : index
    %c0_2 = arith.constant 0 : index
    %1 = vector.load %arg3[%c0_1, %c0_2] : memref<128x128xf32, #tpu.memory_space<vmem>>, vector<128x128xf32>
    %cst = arith.constant dense<0.000000e+00> : vector<16x128xf32>
    %2 = tpu.matmul %0, %1, %cst {dimension_numbers = #tpu.dot_dimension_numbers<[1], [0], [0], [1], [0, 0, 1, 1], [], []>} : vector<16x128xf32>, vector<128x128xf32>, vector<16x128xf32> -> vector<16x128xf32>
    %c0_3 = arith.constant 0 : index
    %c0_4 = arith.constant 0 : index
    %3 = vector.load %arg4[%c0_3, %c0_4] : memref<1x128xf32, #tpu.memory_space<vmem>>, vector<1x128xf32>
    %4 = vector.broadcast %3 : vector<1x128xf32> to vector<16x128xf32>
    %5 = arith.addf %2, %4 : vector<16x128xf32>
    %cst_5 = arith.constant 0.000000e+00 : f32
    %6 = vector.broadcast %cst_5 : f32 to vector<16x128xf32>
    %7 = arith.maximumf %5, %6 : vector<16x128xf32>
    %c0_6 = arith.constant 0 : index
    %c0_7 = arith.constant 0 : index
    %8 = vector.load %arg5[%c0_6, %c0_7] : memref<128x128xf32, #tpu.memory_space<vmem>>, vector<128x128xf32>
    %cst_8 = arith.constant dense<0.000000e+00> : vector<16x128xf32>
    %9 = tpu.matmul %7, %8, %cst_8 {dimension_numbers = #tpu.dot_dimension_numbers<[1], [0], [0], [1], [0, 0, 1, 1], [], []>} : vector<16x128xf32>, vector<128x128xf32>, vector<16x128xf32> -> vector<16x128xf32>
    %c0_i32 = arith.constant 0 : i32
    %10 = arith.cmpi eq, %arg1, %c0_i32 : i32
    %11 = arith.extui %10 : i1 to i32
    %c0_i32_9 = arith.constant 0 : i32
    %12 = arith.cmpi ne, %11, %c0_i32_9 : i32
    scf.if %12 {
      %c0_12 = arith.constant 0 : index
      %c0_13 = arith.constant 0 : index
      %16 = vector.load %arg6[%c0_12, %c0_13] : memref<1x128xf32, #tpu.memory_space<vmem>>, vector<1x128xf32>
      %17 = vector.broadcast %16 : vector<1x128xf32> to vector<16x128xf32>
      %18 = arith.addf %9, %17 : vector<16x128xf32>
      %c0_14 = arith.constant 0 : index
      %c0_15 = arith.constant 0 : index
      %19 = vector.load %arg7[%c0_14, %c0_15] : memref<16x128xf32, #tpu.memory_space<vmem>>, vector<16x128xf32>
      tpu.vector_store %arg7[%c0_14, %c0_15], %18 {strides = array<i32>} : memref<16x128xf32, #tpu.memory_space<vmem>>, vector<16x128xf32>,
    } else {
    }
    %c0_i32_10 = arith.constant 0 : i32
    %13 = arith.cmpi sgt, %arg1, %c0_i32_10 : i32
    %14 = arith.extui %13 : i1 to i32
    %c0_i32_11 = arith.constant 0 : i32
    %15 = arith.cmpi ne, %14, %c0_i32_11 : i32
    scf.if %15 {
      %c0_12 = arith.constant 0 : index
      %c0_13 = arith.constant 0 : index
      %16 = vector.load %arg7[%c0_12, %c0_13] : memref<16x128xf32, #tpu.memory_space<vmem>>, vector<16x128xf32>
      %17 = arith.addf %16, %9 : vector<16x128xf32>
      %c0_14 = arith.constant 0 : index
      %c0_15 = arith.constant 0 : index
      %18 = vector.load %arg7[%c0_14, %c0_15] : memref<16x128xf32, #tpu.memory_space<vmem>>, vector<16x128xf32>
      tpu.vector_store %arg7[%c0_14, %c0_15], %17 {strides = array<i32>} : memref<16x128xf32, #tpu.memory_space<vmem>>, vector<16x128xf32>,
    } else {
    }
    return
  }
  func.func @transform_0(%arg0: i32, %arg1: i32) -> (i32, i32) {
    %c0_i32 = arith.constant 0 : i32
    %c0_i32_0 = arith.constant 0 : i32
    return %arg0, %c0_i32 : i32, i32
  }
  func.func @transform_1(%arg0: i32, %arg1: i32) -> (i32, i32) {
    %c0_i32 = arith.constant 0 : i32
    %c0_i32_0 = arith.constant 0 : i32
    return %c0_i32, %arg1 : i32, i32
  }
  func.func @transform_2(%arg0: i32, %arg1: i32) -> (i32, i32) {
    %c0_i32 = arith.constant 0 : i32
    %c0_i32_0 = arith.constant 0 : i32
    return %c0_i32, %arg1 : i32, i32
  }
  func.func @transform_3(%arg0: i32, %arg1: i32) -> (i32, i32) {
    %c0_i32 = arith.constant 0 : i32
    %c0_i32_0 = arith.constant 0 : i32
    return %arg1, %c0_i32 : i32, i32
  }
  func.func @transform_4(%arg0: i32, %arg1: i32) -> (i32, i32) {
    %c0_i32 = arith.constant 0 : i32
    %c0_i32_0 = arith.constant 0 : i32
    %c0_i32_1 = arith.constant 0 : i32
    return %c0_i32, %c0_i32_0 : i32, i32
  }
  func.func @transform_5(%arg0: i32, %arg1: i32) -> (i32, i32) {
    %c0_i32 = arith.constant 0 : i32
    %c0_i32_0 = arith.constant 0 : i32
    return %arg0, %c0_i32 : i32, i32
  }
}

</mosaic_0001>

<bundles_post_ra>
// kernel: tpu_custom_call.1
= control target key start
LH: loop header
LB: loop body
LE: loop exit
PB: predicated region body
PF: predicated region fallthrough
CT: control target
= control target key end

     0   :  { %10 = vsyncpa [#allocation3], 0  ;;  %s679_s0 = inlined_call_operand.hbm [shape: f32[16,128], index: 0, kind: input, shape index: {}]   ;;  %s680_s1 = inlined_call_operand.hbm [shape: f32[128,128], index: 1, kind: input, shape index: {}]   ;;  %s681_s2 = inlined_call_operand.vmem [shape: f32[1,128], index: 2, kind: input, shape index: {}]   ;;  %s682_s3 = inlined_call_operand.hbm [shape: f32[128,128], index: 3, kind: input, shape index: {}]   ;;  %s683_s4 = inlined_call_operand.vmem [shape: f32[1,128], index: 4, kind: input, shape index: {}]   ;;  %s684_s5 = inlined_call_operand.hbm [shape: f32[16,128], index: 5, kind: output, shape index: {}]  }
   0x1   :  { %11 = vsyncpa [#allocation6], 0 }
   0x2   :  { %12 = vsyncpa [#allocation4], 0  ;;  %s570_s18 = smov [#allocation5]   ;;  %s571_s20 = smov [#allocation2]  }
   0x3   :  { %s30_s19 = sshll.u32 %s570_s18, 4  ;;  %s18_s21 = sshll.u32 %s571_s20, 4  ;;  %s31_s19 = int_to_ptr.vmem [resolvable:$true] %s30_s19  ;;  %s606_s21 = int_to_ptr.vmem [resolvable:$true] %s18_s21 }
   0x4   :  { %s476_s24 = scalar_lea.hbm %s680_s1, 2048 }
   0x5   :  { %p477_p0 = scmp.ne.s32.totalorder %s680_s1, %s476_s24  ;;  %p480_p1 = scmp.lt.u32.totalorder %s476_s24, %s680_s1 }
   0x7   :  { %p482_p2 = pnand %p480_p1, %p477_p0 }
   0x9   :  { %485 = shalt.err (!%p482_p2)
}
   0xa   :  { %s486_s29 = scalar_lea.vmem %s31_s19, 2048  ;;  %p491_p4 = scmp.lt.s32.totalorder %s31_s19, %s31_s19 }
   0xb   :  { %p487_p3 = scmp.ne.s32.totalorder %s31_s19, %s486_s29  ;;  %p492_p5 = scmp.lt.s32.totalorder %s486_s29, %s486_s29 }
   0xd   :  { %p493_p6 = por %p492_p5, %p491_p4 }
   0xf   :  { %p494_p7 = pnand %p493_p6, %p487_p3 }
  0x11   :  { %497 = shalt.err (!%p494_p7)
}
  0x12   :  { %s572_s30 = smov 128   ;;  %s573_s6 = smov 8  }
  0x13   :  { %36 = dma.hbm_to_vmem [thread:$0]  %s680_s1, 2048, %s31_s19, [#allocation6], %s572_s30, %s572_s30, %s573_s6  }
  0x14   :  { %s498_s11 = scalar_lea.hbm %s679_s0, 256 }
  0x15   :  { %p499_p8 = scmp.ne.s32.totalorder %s679_s0, %s498_s11  ;;  %p502_p9 = scmp.lt.u32.totalorder %s498_s11, %s679_s0 }
  0x17   :  { %p504_p10 = pnand %p502_p9, %p499_p8 }
  0x19   :  { %507 = shalt.err (!%p504_p10)
}
  0x1a   :  { %s508_s16 = scalar_lea.vmem %s606_s21, 256  ;;  %p513_p12 = scmp.lt.s32.totalorder %s606_s21, %s606_s21 }
  0x1b   :  { %p509_p11 = scmp.ne.s32.totalorder %s606_s21, %s508_s16  ;;  %p514_p13 = scmp.lt.s32.totalorder %s508_s16, %s508_s16 }
  0x1d   :  { %p515_p0 = por %p514_p13, %p513_p12 }
  0x1f   :  { %p516_p1 = pnand %p515_p0, %p509_p11 }
  0x21   :  { %519 = shalt.err (!%p516_p1)
}
  0x22   :  { %24 = dma.hbm_to_vmem [thread:$0]  %s679_s0, 256, %s606_s21, [#allocation3], %s572_s30, %s572_s30, %s573_s6  }
  0x23   :  { %s574_s18 = smov [#allocation7]   ;;  %s520_s23 = scalar_lea.hbm %s682_s3, 2048 }
  0x24   :  { %s44_s19 = sshll.u32 %s574_s18, 4  ;;  %p521_p2 = scmp.ne.s32.totalorder %s682_s3, %s520_s23  ;;  %s45_s19 = int_to_ptr.vmem [resolvable:$true] %s44_s19 }
  0x25   :  { %p524_p3 = scmp.lt.u32.totalorder %s520_s23, %s682_s3 }
  0x27   :  { %p526_p4 = pnand %p524_p3, %p521_p2 }
  0x29   :  { %529 = shalt.err (!%p526_p4)
}
  0x2a   :  { %s530_s28 = scalar_lea.vmem %s45_s19, 2048  ;;  %p535_p6 = scmp.lt.s32.totalorder %s45_s19, %s45_s19 }
  0x2b   :  { %p531_p5 = scmp.ne.s32.totalorder %s45_s19, %s530_s28  ;;  %p536_p7 = scmp.lt.s32.totalorder %s530_s28, %s530_s28 }
  0x2d   :  { %p537_p8 = por %p536_p7, %p535_p6 }
  0x2f   :  { %p538_p9 = pnand %p537_p8, %p531_p5 }
  0x31   :  { %541 = shalt.err (!%p538_p9)
}
  0x32   :  { %50 = dma.hbm_to_vmem [thread:$0]  %s682_s3, 2048, %s45_s19, [#allocation6], %s572_s30, %s572_s30, %s573_s6  }
  0x33   :  { %564 = dma.done.wait [#allocation3], 256  }
  0x34   :  { %565 = vsyncadd [#allocation3], 4294967040 }
  0x35   :  { %566 = dma.done.wait [#allocation6], 4096  }
  0x36   :  { %567 = vsyncadd [#allocation6], 4294963200  ;;  %v64_v0 = vld [vmem:[#allocation5] sm:$0xff]  ;;  %v65_v1 = vld [vmem:[#allocation5 + $0x8] sm:$0xff]  ;;  %s575_s9 = smov [#allocation8]  }
  0x37   :  { %v66_v2 = vld [vmem:[#allocation5 + $0x10] sm:$0xff]  ;;  %v406_v3 = vpack.c.bf16 %v65_v1, %v64_v0  ;;  %v67_v4 = vld [vmem:[#allocation5 + $0x18] sm:$0xff]  ;;  %v68_v6 = vld [vmem:[#allocation5 + $0x20] sm:$0xff]  ;;  %s285_s10 = sshll.u32 %s575_s9, 4  ;;  %s286_s10 = int_to_ptr.vmem [resolvable:$true] %s285_s10 }
  0x38   :  { %v410_v5 = vpack.c.bf16 %v67_v4, %v66_v2  ;;  %v69_v7 = vld [vmem:[#allocation5 + $0x28] sm:$0xff]  ;;  %v70_v9 = vld [vmem:[#allocation5 + $0x30] sm:$0xff]  ;;  %v71_v10 = vld [vmem:[#allocation5 + $0x38] sm:$0xff]  ;;  %p547_p11 = scmp.lt.s32.totalorder %s286_s10, %s286_s10 }
  0x39   :  { %407 = vmatprep.subr.bf16.mxu0 %v406_v3  ;;  %v414_v8 = vpack.c.bf16 %v69_v7, %v68_v6  ;;  %v62_v11 = vld [vmem:[#allocation2] sm:$0xff]  ;;  %v164_v12 = vld [vmem:[#allocation7] sm:$0xff]  ;;  %v165_v13 = vld [vmem:[#allocation7 + $0x8] sm:$0xff]  ;;  %v418_v20 = vpack.c.bf16 %v71_v10, %v70_v9 }
  0x3a   :  { %409 = vmatpush3.bf16.msra.mxu0 %v406_v3  ;;  %368 = vmatprep.mubr.f32.mxu0 %v62_v11  ;;  %v166_v14 = vld [vmem:[#allocation7 + $0x10] sm:$0xff]  ;;  %v438_v15 = vpack.c.bf16 %v165_v13, %v164_v12  ;;  %v167_v16 = vld [vmem:[#allocation7 + $0x18] sm:$0xff]  ;;  %v168_v18 = vld [vmem:[#allocation7 + $0x20] sm:$0xff] }
  0x3b   :  { %411 = vmatprep.subr.bf16.mxu0 %v410_v5  ;;  %v442_v17 = vpack.c.bf16 %v167_v16, %v166_v14  ;;  %v169_v19 = vld [vmem:[#allocation7 + $0x28] sm:$0xff]  ;;  %v72_v21 = vld [vmem:[#allocation5 + $0x40] sm:$0xff]  ;;  %v170_v24 = vld [vmem:[#allocation7 + $0x30] sm:$0xff] }
  0x3c   :  { %439 = vmatprep.subr.bf16.mxu1 %v438_v15  ;;  %v73_v22 = vld [vmem:[#allocation5 + $0x48] sm:$0xff]  ;;  %v446_v23 = vpack.c.bf16 %v169_v19, %v168_v18  ;;  %v171_v25 = vld [vmem:[#allocation7 + $0x38] sm:$0xff]  ;;  %v74_v27 = vld [vmem:[#allocation5 + $0x50] sm:$0xff] }
  0x3d   :  { %441 = vmatpush3.bf16.msra.mxu1 %v438_v15  ;;  %v422_v26 = vpack.c.bf16 %v73_v22, %v72_v21  ;;  %v75_v28 = vld [vmem:[#allocation5 + $0x58] sm:$0xff]  ;;  %v450_v29 = vpack.c.bf16 %v171_v25, %v170_v24  ;;  %v172_v30 = vld [vmem:[#allocation7 + $0x40] sm:$0xff]  ;;  %v173_v31 = vld [vmem:[#allocation7 + $0x48] sm:$0xff] }
  0x3e   :  { %413 = vmatpush3.bf16.msra.mxu0 %v410_v5  ;;  %443 = vmatprep.subr.bf16.mxu1 %v442_v17  ;;  %v426_v32 = vpack.c.bf16 %v75_v28, %v74_v27  ;;  %v76_v33 = vld [vmem:[#allocation5 + $0x60] sm:$0xff]  ;;  %v77_v34 = vld [vmem:[#allocation5 + $0x68] sm:$0xff]  ;;  %v454_v35 = vpack.c.bf16 %v173_v31, %v172_v30  ;;  %v174_v36 = vld [vmem:[#allocation7 + $0x50] sm:$0xff] }
  0x3f   :  { %415 = vmatprep.subr.bf16.mxu0 %v414_v8  ;;  %v175_v37 = vld [vmem:[#allocation7 + $0x58] sm:$0xff]  ;;  %v430_v38 = vpack.c.bf16 %v77_v34, %v76_v33  ;;  %v78_v39 = vld [vmem:[#allocation5 + $0x70] sm:$0xff]  ;;  %v176_v42 = vld [vmem:[#allocation7 + $0x60] sm:$0xff] }
  0x40   :  { %v79_v40 = vld [vmem:[#allocation5 + $0x78] sm:$0xff]  ;;  %v458_v41 = vpack.c.bf16 %v175_v37, %v174_v36  ;;  %v177_v43 = vld [vmem:[#allocation7 + $0x68] sm:$0xff]  ;;  %v178_v47 = vld [vmem:[#allocation7 + $0x70] sm:$0xff] }
  0x41   :  { %445 = vmatpush3.bf16.msra.mxu1 %v442_v17  ;;  %v434_v44 = vpack.c.bf16 %v79_v40, %v78_v39  ;;  %v462_v45 = vpack.c.bf16 %v177_v43, %v176_v42  ;;  %v63_v46 = vld [vmem:[#allocation2 + $0x8] sm:$0xff]  ;;  %v298_v50 = vld [vmem:[%s681_s2] ss:$0 sm:$0xff]  ;;  %s542_s2 = scalar_lea.vmem %s286_s10, 256 }
  0x42   :  { %417 = vmatpush3.bf16.msra.mxu0 %v414_v8  ;;  %447 = vmatprep.subr.bf16.mxu1 %v446_v23  ;;  %v179_v48 = vld [vmem:[#allocation7 + $0x78] sm:$0xff]  ;;  %v299_v57 = vld [vmem:[%s683_s4] ss:$0 sm:$0xff]  ;;  %p543_p10 = scmp.ne.s32.totalorder %s286_s10, %s542_s2  ;;  %p548_p12 = scmp.lt.s32.totalorder %s542_s2, %s542_s2 }
  0x43   :  { %419 = vmatprep.subr.bf16.mxu0 %v418_v20  ;;  %v466_v49 = vpack.c.bf16 %v179_v48, %v178_v47 }
  0x44   :  { %p549_p13 = por %p548_p12, %p547_p11 }
  0x45   :  { %449 = vmatpush3.bf16.msra.mxu1 %v446_v23 }
  0x46   :  { %421 = vmatpush3.bf16.msra.mxu0 %v418_v20  ;;  %451 = vmatprep.subr.bf16.mxu1 %v450_v29  ;;  %p550_p0 = pnand %p549_p13, %p543_p10 }
  0x47   :  { %423 = vmatprep.subr.bf16.mxu0 %v422_v26 }
  0x49   :  { %453 = vmatpush3.bf16.msra.mxu1 %v450_v29 }
  0x4a   :  { %425 = vmatpush3.bf16.msra.mxu0 %v422_v26  ;;  %455 = vmatprep.subr.bf16.mxu1 %v454_v35 }
  0x4b   :  { %427 = vmatprep.subr.bf16.mxu0 %v426_v32 }
  0x4d   :  { %457 = vmatpush3.bf16.msra.mxu1 %v454_v35 }
  0x4e   :  { %429 = vmatpush3.bf16.msra.mxu0 %v426_v32  ;;  %459 = vmatprep.subr.bf16.mxu1 %v458_v41 }
  0x4f   :  { %431 = vmatprep.subr.bf16.mxu0 %v430_v38 }
  0x51   :  { %461 = vmatpush3.bf16.msra.mxu1 %v458_v41 }
  0x52   :  { %433 = vmatpush3.bf16.msra.mxu0 %v430_v38  ;;  %463 = vmatprep.subr.bf16.mxu1 %v462_v45 }
  0x53   :  { %435 = vmatprep.subr.bf16.mxu0 %v434_v44 }
  0x55   :  { %465 = vmatpush3.bf16.msra.mxu1 %v462_v45 }
  0x56   :  { %437 = vmatpush3.bf16.msra.mxu0 %v434_v44  ;;  %467 = vmatprep.subr.bf16.mxu1 %v466_v49 }
  0x59   :  { %369 = vmatmul.mubr.f32.vlgmr.msra.gmra.mrb[0].mxu0 %v63_v46  ;;  %469 = vmatpush3.bf16.msra.mxu1 %v466_v49 }
 0x12c   :  { %v370_v51 = vpop.f32.mrb[0].mxu0 }
 0x12d   :  { %v159_v52 = vadd.f32 %v370_v51, %v298_v50  ;;  %v153_v53 = vpop.f32.mrb[1].mxu0 }
 0x12e   :  { %v154_v54 = vadd.f32 %v298_v50, %v153_v53 }
 0x12f   :  { %v163_v56 = vmax.f32 %v159_v52, 0.0 }
 0x130   :  { %v162_v55 = vmax.f32 %v154_v54, 0.0 }
 0x132   :  { %403 = vmatprep.mubr.f32.mxu1 %v162_v55 }
 0x133   :  { %404 = vmatmul.mubr.f32.vlgmr.msra.gmra.mrb[0].mxu1 %v163_v56 }
 0x206   :  { %v405_v58 = vpop.f32.mrb[0].mxu1 }
 0x207   :  { %v267_v59 = vadd.f32 %v405_v58, %v299_v57  ;;  %v246_v60 = vpop.f32.mrb[1].mxu1 }
 0x208   :  { %v266_v61 = vadd.f32 %v299_v57, %v246_v60 }
 0x209   :  { %269 = vst [vmem:[#allocation8 + $0x8] sm:$0xff] %v267_v59 }
 0x20a   :  { %268 = vst [vmem:[#allocation8] sm:$0xff] %v266_v61 }
 0x20b   :  { %553 = shalt.err (!%p550_p0)
}
 0x20c   :  { %s554_s4 = scalar_lea.hbm %s684_s5, 256 }
 0x20d   :  { %p555_p1 = scmp.ne.s32.totalorder %s684_s5, %s554_s4  ;;  %p558_p2 = scmp.lt.u32.totalorder %s554_s4, %s684_s5 }
 0x20f   :  { %p560_p3 = pnand %p558_p2, %p555_p1 }
 0x211   :  { %563 = shalt.err (!%p560_p3)
}
 0x212   :  { %291 = dma.vmem_to_hbm [thread:$0]  %s286_s10, 256, %s684_s5, [#allocation4], %s572_s30, %s572_s30, %s573_s6  }
 0x213   :  { %568 = dma.done.wait [#allocation4], 256  }
 0x214   :  { %569 = vsyncadd [#allocation4], 4294967040 }
 0x215   :  { %295 = vsyncpa [#allocation3], 1 }
 0x216   :  { %296 = vsyncpa [#allocation6], 1 }
 0x217   :  { %297 = vsyncpa [#allocation4], 1 }

</bundles_post_ra>
